<compile_context>
chip_gen: v7x
topology: tpu7x:2x2x1
jax: 0.10.0
libtpu: 0.0.40
codegen_flags: <defaults>
</compile_context>

<pallas_src>
import jax
import jax.numpy as jnp
from jax.experimental import pallas as pl
from jax.experimental.pallas import tpu as pltpu

_SQRT_HALF = 0.7071067811865476


def _round_up(x, m):
    return (x + m - 1) // m * m


# ----------------------------------------------------------------------------
# Kernel: one (row-tile, hidden-chunk) step of the fused MLP.
# grid = (n_row_tiles, n_hidden_chunks); the hidden axis is the fc2 reduction,
# accumulated directly into the resident f32 output tile.
# ----------------------------------------------------------------------------
def _mlp_kernel(x_ref, w1_ref, b1_ref, w2_ref, b2_ref, o_ref):
    k = pl.program_id(1)

    @pl.when(k == 0)
    def _init():
        # Start the accumulator from the second bias (broadcast over rows).
        o_ref[...] = jnp.broadcast_to(b2_ref[...], o_ref.shape)

    # fc1 on the MXU: bf16 inputs, f32 accumulation.
    h = jnp.dot(x_ref[...], w1_ref[...], preferred_element_type=jnp.float32)
    h = h + b1_ref[...]
    # Exact (erf-based) GELU in f32 — matches torch.nn.GELU() default.
    h = 0.5 * h * (1.0 + jax.lax.erf(h * _SQRT_HALF))
    # fc2 on the MXU, accumulated into the resident f32 output tile.
    o_ref[...] += jnp.dot(h.astype(jnp.bfloat16), w2_ref[...],
                          preferred_element_type=jnp.float32)


# ----------------------------------------------------------------------------
# Parameter packing: pad feature dims to multiples of 128 (lane-dense MXU
# tiles, unmasked stores), store weights in bf16, biases in f32.  Zero padding
# is exact: padded hidden columns give GELU(0)=0 and hit zero rows of w2;
# padded output columns are sliced off by the wrapper.
# ----------------------------------------------------------------------------
def pack_params(params):
    d, h = params["w1"].shape
    d_p, h_p = _round_up(d, 128), _round_up(h, 128)
    w1 = jnp.zeros((d_p, h_p), jnp.bfloat16).at[:d, :h].set(
        params["w1"].astype(jnp.bfloat16))
    w2 = jnp.zeros((h_p, d_p), jnp.bfloat16).at[:h, :d].set(
        params["w2"].astype(jnp.bfloat16))
    b1 = jnp.zeros((1, h_p), jnp.float32).at[0, :h].set(params["b1"])
    b2 = jnp.zeros((1, d_p), jnp.float32).at[0, :d].set(params["b2"])
    return {"w1": w1, "b1": b1, "w2": w2, "b2": b2, "dim": d, "hidden_dim": h}


# ----------------------------------------------------------------------------
# Tiling / VMEM planning
# ----------------------------------------------------------------------------
def _vmem_capacity_bytes():
    try:
        return int(pltpu.get_tpu_info().vmem_capacity_bytes)
    except Exception:
        return 64 << 20  # conservative (v7x per-core) fallback


def _bspec(shape, index_map, buffers=None):
    """BlockSpec with optional explicit buffer count (falls back gracefully)."""
    if buffers is not None and hasattr(pl, "Buffered"):
        try:
            return pl.BlockSpec(shape, index_map,
                                pipeline_mode=pl.Buffered(buffers))
        except TypeError:
            pass
    return pl.BlockSpec(shape, index_map)


def _pick_row_tile(rows_p, tm_max):
    """Largest 16-aligned row tile <= tm_max, preferring multiples of 128 that
    divide rows_p exactly (no padded garbage rows, no masked stores)."""
    tm_max = max(16, (min(tm_max, rows_p) // 16) * 16)
    best = 0
    for tm in range(tm_max, 15, -16):
        if rows_p % tm == 0 and (tm % 128 == 0 or tm == rows_p):
            best = tm
            break
    if best == 0:
        for tm in range(tm_max, 15, -16):
            if rows_p % tm == 0:
                best = tm
                break
    if best >= max(16, tm_max // 4):
        return best, rows_p
    # Fall back: pad rows up to a multiple of a lane-friendly tile.
    tm = (tm_max // 128) * 128 if tm_max >= 128 else tm_max
    tm = max(16, tm)
    return tm, _round_up(rows_p, tm)


def _plan(rows, d_p, h_p):
    """Returns (tm, rows_p, th, n_k, weight_buffers, vmem_limit_bytes)."""
    cap = _vmem_capacity_bytes()
    budget = max(cap - (32 << 20), cap // 2)   # ~96 MiB on 128 MiB parts, ~32 MiB on v7x
    max_tile = 1024 if cap >= (100 << 20) else 512

    # Hidden-dim chunking: smallest number of chunks whose bf16 weight slabs
    # (plus bias chunks) fit in half the budget.  n=1 => weights fully resident
    # and single-buffered (grid-invariant); n>1 => double-buffered chunks.
    nh = h_p // 128
    th, n_k, w_nbuf = 128, nh, 2
    for n in range(1, nh + 1):
        if nh % n:
            continue
        cand_th = h_p // n
        nbuf = 1 if n == 1 else 2
        wbytes = nbuf * (4 * d_p * cand_th + 4 * cand_th) + 4 * d_p
        if wbytes <= budget // 2:
            th, n_k, w_nbuf = cand_th, n, nbuf
            break
    weight_bytes = w_nbuf * (4 * d_p * th + 4 * th) + 4 * d_p
    if weight_bytes > budget:
        # TODO(synk): for extreme dim, a d-chunk grid axis would also be needed.
        raise ValueError(f"weights ({weight_bytes} B) exceed VMEM budget ({budget} B)")

    # Row tile from the remaining budget (accounts for bf16 x tile, f32 output
    # tile, f32+bf16 hidden intermediate, plus slack for compiler temporaries).
    avail = max(budget - weight_bytes, 1 << 20)
    per_row = (2 * 2 * d_p          # bf16 x tile, double-buffered
               + 2 * 4 * d_p        # f32 output tile, double-buffered
               + 4 * th + 2 * th    # f32 + bf16 hidden intermediate
               + 4 * d_p)           # slack
    tm_max = int(min(avail // per_row, max_tile))
    tm_max = max(16, (tm_max // 16) * 16)

    rows_q = _round_up(rows, 16)    # bf16 sublane quantum
    # Megacore: keep >=~8 grid steps on the row axis when rows are plentiful.
    if rows_q >= 8 * 128:
        tm_max = min(tm_max, max(128, (rows_q // 8 // 16) * 16))

    tm, rows_p = _pick_row_tile(rows_q, tm_max)
    vmem_limit = int(min(cap - (8 << 20), budget + (16 << 20)))
    return tm, rows_p, th, n_k, w_nbuf, vmem_limit


# ----------------------------------------------------------------------------
# Wrapper
# ----------------------------------------------------------------------------
def mlp_forward(x, packed):
    d = packed["dim"]
    d_p, h_p = packed["w1"].shape
    assert x.shape[-1] == d, (x.shape, d)
    rows = int(x.size // d)

    # bf16 activation I/O: halves the input DMA; math is unchanged because the
    # kernel feeds bf16 to the MXU anyway (f32 accumulation throughout).
    x2 = x.reshape(rows, d).astype(jnp.bfloat16)
    if d_p != d:
        x2 = jnp.pad(x2, ((0, 0), (0, d_p - d)))

    tm, rows_p, th, n_k, w_nbuf, vmem_limit = _plan(rows, d_p, h_p)
    if rows_p != rows:
        x2 = jnp.pad(x2, ((0, rows_p - rows), (0, 0)))

    grid = (rows_p // tm, n_k)

    out = pl.pallas_call(
        _mlp_kernel,
        out_shape=jax.ShapeDtypeStruct((rows_p, d_p), jnp.float32),
        grid=grid,
        in_specs=[
            _bspec((tm, d_p), lambda i, k: (i, 0)),                   # x (bf16) row tile
            _bspec((d_p, th), lambda i, k: (0, k), buffers=w_nbuf),   # w1 chunk
            _bspec((1, th), lambda i, k: (0, k), buffers=w_nbuf),     # b1 chunk
            _bspec((th, d_p), lambda i, k: (k, 0), buffers=w_nbuf),   # w2 chunk
            _bspec((1, d_p), lambda i, k: (0, 0), buffers=1),         # b2 (invariant)
        ],
        out_specs=pl.BlockSpec((tm, d_p), lambda i, k: (i, 0)),
        compiler_params=pltpu.CompilerParams(
            dimension_semantics=("parallel", "arbitrary"),
            vmem_limit_bytes=vmem_limit,
        ),
    )(x2, packed["w1"], packed["b1"], packed["w2"], packed["b2"])

    return out[:rows, :d].reshape(x.shape).astype(x.dtype)


# ----------------------------------------------------------------------------
# Deterministic parameter init (torch.nn.Linear-style uniform) + reference
# ----------------------------------------------------------------------------
def make_mlp_params(key, dim, hidden_dim=None):
    hidden_dim = dim if hidden_dim is None else hidden_dim
    k1, k2, k3, k4 = jax.random.split(key, 4)
    lim1 = 1.0 / (dim ** 0.5)
    lim2 = 1.0 / (hidden_dim ** 0.5)
    return {
        # weights stored pre-transposed as (in_features, out_features)
        "w1": jax.random.uniform(k1, (dim, hidden_dim), jnp.float32, -lim1, lim1),
        "b1": jax.random.uniform(k2, (hidden_dim,), jnp.float32, -lim1, lim1),
        "w2": jax.random.uniform(k3, (hidden_dim, dim), jnp.float32, -lim2, lim2),
        "b2": jax.random.uniform(k4, (dim,), jnp.float32, -lim2, lim2),
    }


def _reference(x, packed):
    """Plain-jnp mirror of the kernel math (bf16 matmul inputs, f32 accum)."""
    d, h = packed["dim"], packed["hidden_dim"]
    w1 = packed["w1"][:d, :h]
    w2 = packed["w2"][:h, :d]
    b1 = packed["b1"][0, :h]
    b2 = packed["b2"][0, :d]
    xf = x.reshape(-1, d).astype(jnp.bfloat16)
    hpre = jnp.dot(xf, w1, preferred_element_type=jnp.float32) + b1
    hact = 0.5 * hpre * (1.0 + jax.lax.erf(hpre * _SQRT_HALF))
    y = jnp.dot(hact.astype(jnp.bfloat16), w2, preferred_element_type=jnp.float32) + b2
    return y.reshape(x.shape).astype(x.dtype)


if __name__ == "__main__":
    # Small shapes (exercise the 128-padding path): dim=32, hidden=64, 128 rows.
    dim, hidden_dim = 32, 64
    B, N = 2, 64

    key = jax.random.PRNGKey(0)
    kx, kp = jax.random.split(key)
    x = jax.random.normal(kx, (B, N, dim), jnp.float32)
    params = make_mlp_params(kp, dim, hidden_dim)
    packed = pack_params(params)

    y = mlp_forward(x, packed)
    y = jax.block_until_ready(y)

    assert y.shape == x.shape, y.shape
    assert bool(jnp.all(jnp.isfinite(y)))

    y_ref = _reference(x, packed)
    max_err = float(jnp.max(jnp.abs(y - y_ref)))
    assert bool(jnp.allclose(y, y_ref, rtol=1e-3, atol=1e-3)), max_err

    print("KERNEL_OK")
</pallas_src>

<mosaic_0001>
module attributes {stable_mosaic.version = 11 : i64} {
  func.func @_mlp_kernel(%arg0: i32, %arg1: i32, %arg2: memref<128x128xbf16, #tpu.memory_space<vmem>>, %arg3: memref<128x128xbf16, #tpu.memory_space<vmem>>, %arg4: memref<1x128xf32, #tpu.memory_space<vmem>>, %arg5: memref<128x128xbf16, #tpu.memory_space<vmem>>, %arg6: memref<1x128xf32, #tpu.memory_space<vmem>>, %arg7: memref<128x128xf32, #tpu.memory_space<vmem>>) attributes {dimension_semantics = [#tpu.dimension_semantics<parallel>, #tpu.dimension_semantics<arbitrary>], iteration_bounds = array<i64: 1, 1>, scalar_prefetch = 0 : i64, scratch_operands = 0 : i64, tpu.core_type = #tpu.core_type<tc>, window_params = [{transform_indices = @transform_0, window_bounds = array<i64: 128, 128>}, {pipeline_mode = #tpu.pipeline_mode<synchronous>, transform_indices = @transform_1, window_bounds = array<i64: 128, 128>}, {pipeline_mode = #tpu.pipeline_mode<synchronous>, transform_indices = @transform_2, window_bounds = array<i64: 1, 128>}, {pipeline_mode = #tpu.pipeline_mode<synchronous>, transform_indices = @transform_3, window_bounds = array<i64: 128, 128>}, {pipeline_mode = #tpu.pipeline_mode<synchronous>, transform_indices = @transform_4, window_bounds = array<i64: 1, 128>}, {transform_indices = @transform_5, window_bounds = array<i64: 128, 128>}]} {
    %c0_i32 = arith.constant 0 : i32
    %0 = arith.cmpi eq, %arg1, %c0_i32 : i32
    %1 = arith.extui %0 : i1 to i32
    %c0_i32_0 = arith.constant 0 : i32
    %2 = arith.cmpi ne, %1, %c0_i32_0 : i32
    scf.if %2 {
      %c0_16 = arith.constant 0 : index
      %c0_17 = arith.constant 0 : index
      %23 = vector.load %arg6[%c0_16, %c0_17] : memref<1x128xf32, #tpu.memory_space<vmem>>, vector<1x128xf32>
      %24 = vector.shape_cast %23 : vector<1x128xf32> to vector<1x128xf32>
      %25 = vector.broadcast %24 : vector<1x128xf32> to vector<128x128xf32>
      %c0_18 = arith.constant 0 : index
      %c0_19 = arith.constant 0 : index
      %26 = vector.load %arg7[%c0_18, %c0_19] : memref<128x128xf32, #tpu.memory_space<vmem>>, vector<128x128xf32>
      tpu.vector_store %arg7[%c0_18, %c0_19], %25 {strides = array<i32>} : memref<128x128xf32, #tpu.memory_space<vmem>>, vector<128x128xf32>,
    } else {
    }
    %c0 = arith.constant 0 : index
    %c0_1 = arith.constant 0 : index
    %3 = vector.load %arg2[%c0, %c0_1] : memref<128x128xbf16, #tpu.memory_space<vmem>>, vector<128x128xbf16>
    %c0_2 = arith.constant 0 : index
    %c0_3 = arith.constant 0 : index
    %4 = vector.load %arg3[%c0_2, %c0_3] : memref<128x128xbf16, #tpu.memory_space<vmem>>, vector<128x128xbf16>
    %cst = arith.constant dense<0.000000e+00> : vector<128x128xf32>
    %5 = tpu.matmul %3, %4, %cst {dimension_numbers = #tpu.dot_dimension_numbers<[1], [0], [0], [1], [0, 0, 1, 1], [], []>} : vector<128x128xbf16>, vector<128x128xbf16>, vector<128x128xf32> -> vector<128x128xf32>
    %c0_4 = arith.constant 0 : index
    %c0_5 = arith.constant 0 : index
    %6 = vector.load %arg4[%c0_4, %c0_5] : memref<1x128xf32, #tpu.memory_space<vmem>>, vector<1x128xf32>
    %7 = vector.broadcast %6 : vector<1x128xf32> to vector<128x128xf32>
    %8 = arith.addf %5, %7 : vector<128x128xf32>
    %cst_6 = arith.constant 5.000000e-01 : f32
    %9 = vector.broadcast %cst_6 : f32 to vector<128x128xf32>
    %10 = arith.mulf %9, %8 : vector<128x128xf32>
    %cst_7 = arith.constant 0.707106769 : f32
    %11 = vector.broadcast %cst_7 : f32 to vector<128x128xf32>
    %12 = arith.mulf %8, %11 : vector<128x128xf32>
    %13 = math.erf %12 : vector<128x128xf32>
    %cst_8 = arith.constant 1.000000e+00 : f32
    %14 = vector.broadcast %cst_8 : f32 to vector<128x128xf32>
    %15 = arith.addf %14, %13 : vector<128x128xf32>
    %16 = arith.mulf %10, %15 : vector<128x128xf32>
    %c0_9 = arith.constant 0 : index
    %c0_10 = arith.constant 0 : index
    %17 = vector.load %arg7[%c0_9, %c0_10] : memref<128x128xf32, #tpu.memory_space<vmem>>, vector<128x128xf32>
    %18 = arith.truncf %16 : vector<128x128xf32> to vector<128x128xbf16>
    %c0_11 = arith.constant 0 : index
    %c0_12 = arith.constant 0 : index
    %19 = vector.load %arg5[%c0_11, %c0_12] : memref<128x128xbf16, #tpu.memory_space<vmem>>, vector<128x128xbf16>
    %cst_13 = arith.constant dense<0.000000e+00> : vector<128x128xf32>
    %20 = tpu.matmul %18, %19, %cst_13 {dimension_numbers = #tpu.dot_dimension_numbers<[1], [0], [0], [1], [0, 0, 1, 1], [], []>} : vector<128x128xbf16>, vector<128x128xbf16>, vector<128x128xf32> -> vector<128x128xf32>
    %21 = arith.addf %17, %20 : vector<128x128xf32>
    %c0_14 = arith.constant 0 : index
    %c0_15 = arith.constant 0 : index
    %22 = vector.load %arg7[%c0_14, %c0_15] : memref<128x128xf32, #tpu.memory_space<vmem>>, vector<128x128xf32>
    tpu.vector_store %arg7[%c0_14, %c0_15], %21 {strides = array<i32>} : memref<128x128xf32, #tpu.memory_space<vmem>>, vector<128x128xf32>,
    return
  }
  func.func @transform_0(%arg0: i32, %arg1: i32) -> (i32, i32) {
    %c0_i32 = arith.constant 0 : i32
    %c0_i32_0 = arith.constant 0 : i32
    return %arg0, %c0_i32 : i32, i32
  }
  func.func @transform_1(%arg0: i32, %arg1: i32) -> (i32, i32) {
    %c0_i32 = arith.constant 0 : i32
    %c0_i32_0 = arith.constant 0 : i32
    return %c0_i32, %arg1 : i32, i32
  }
  func.func @transform_2(%arg0: i32, %arg1: i32) -> (i32, i32) {
    %c0_i32 = arith.constant 0 : i32
    %c0_i32_0 = arith.constant 0 : i32
    return %c0_i32, %arg1 : i32, i32
  }
  func.func @transform_3(%arg0: i32, %arg1: i32) -> (i32, i32) {
    %c0_i32 = arith.constant 0 : i32
    %c0_i32_0 = arith.constant 0 : i32
    return %arg1, %c0_i32 : i32, i32
  }
  func.func @transform_4(%arg0: i32, %arg1: i32) -> (i32, i32) {
    %c0_i32 = arith.constant 0 : i32
    %c0_i32_0 = arith.constant 0 : i32
    %c0_i32_1 = arith.constant 0 : i32
    return %c0_i32, %c0_i32_0 : i32, i32
  }
  func.func @transform_5(%arg0: i32, %arg1: i32) -> (i32, i32) {
    %c0_i32 = arith.constant 0 : i32
    %c0_i32_0 = arith.constant 0 : i32
    return %arg0, %c0_i32 : i32, i32
  }
}

</mosaic_0001>

<bundles_post_ra>
// kernel: tpu_custom_call.1
= control target key start
LH: loop header
LB: loop body
LE: loop exit
PB: predicated region body
PF: predicated region fallthrough
CT: control target
= control target key end

     0   :  { %10 = vsyncpa [#allocation3], 0  ;;  %s1051_s0 = inlined_call_operand.hbm [shape: bf16[128,128], index: 0, kind: input, shape index: {}]   ;;  %s1052_s1 = inlined_call_operand.hbm [shape: bf16[128,128], index: 1, kind: input, shape index: {}]   ;;  %s1053_s2 = inlined_call_operand.vmem [shape: f32[1,128], index: 2, kind: input, shape index: {}]   ;;  %s1054_s3 = inlined_call_operand.hbm [shape: bf16[128,128], index: 3, kind: input, shape index: {}]   ;;  %s1055_s4 = inlined_call_operand.vmem [shape: f32[1,128], index: 4, kind: input, shape index: {}]   ;;  %s1056_s5 = inlined_call_operand.hbm [shape: f32[128,128], index: 5, kind: output, shape index: {}]  }
   0x1   :  { %11 = vsyncpa [#allocation6], 0 }
   0x2   :  { %12 = vsyncpa [#allocation4], 0  ;;  %s917_s18 = smov [#allocation5]   ;;  %s918_s20 = smov [#allocation2]  }
   0x3   :  { %s30_s19 = sshll.u32 %s917_s18, 4  ;;  %s18_s21 = sshll.u32 %s918_s20, 4  ;;  %s31_s19 = int_to_ptr.vmem [resolvable:$true] %s30_s19  ;;  %s955_s21 = int_to_ptr.vmem [resolvable:$true] %s18_s21 }
   0x4   :  { %s823_s24 = scalar_lea.hbm %s1052_s1, 1024 }
   0x5   :  { %p824_p0 = scmp.ne.s32.totalorder %s1052_s1, %s823_s24  ;;  %p827_p1 = scmp.lt.u32.totalorder %s823_s24, %s1052_s1 }
   0x7   :  { %p829_p2 = pnand %p827_p1, %p824_p0 }
   0x9   :  { %832 = shalt.err (!%p829_p2)
}
   0xa   :  { %s833_s29 = scalar_lea.vmem %s31_s19, 1024  ;;  %p838_p4 = scmp.lt.s32.totalorder %s31_s19, %s31_s19 }
   0xb   :  { %p834_p3 = scmp.ne.s32.totalorder %s31_s19, %s833_s29  ;;  %p839_p5 = scmp.lt.s32.totalorder %s833_s29, %s833_s29 }
   0xd   :  { %p840_p6 = por %p839_p5, %p838_p4 }
   0xf   :  { %p841_p7 = pnand %p840_p6, %p834_p3 }
  0x11   :  { %844 = shalt.err (!%p841_p7)
}
  0x12   :  { %s919_s30 = smov 64   ;;  %s920_s6 = smov 4  }
  0x13   :  { %36 = dma.hbm_to_vmem [thread:$0]  %s1052_s1, 1024, %s31_s19, [#allocation6], %s919_s30, %s919_s30, %s920_s6  }
  0x14   :  { %s845_s11 = scalar_lea.hbm %s1051_s0, 1024 }
  0x15   :  { %p846_p8 = scmp.ne.s32.totalorder %s1051_s0, %s845_s11  ;;  %p849_p9 = scmp.lt.u32.totalorder %s845_s11, %s1051_s0 }
  0x17   :  { %p851_p10 = pnand %p849_p9, %p846_p8 }
  0x19   :  { %854 = shalt.err (!%p851_p10)
}
  0x1a   :  { %s855_s16 = scalar_lea.vmem %s955_s21, 1024  ;;  %p860_p12 = scmp.lt.s32.totalorder %s955_s21, %s955_s21 }
  0x1b   :  { %p856_p11 = scmp.ne.s32.totalorder %s955_s21, %s855_s16  ;;  %p861_p13 = scmp.lt.s32.totalorder %s855_s16, %s855_s16 }
  0x1d   :  { %p862_p0 = por %p861_p13, %p860_p12 }
  0x1f   :  { %p863_p1 = pnand %p862_p0, %p856_p11 }
  0x21   :  { %866 = shalt.err (!%p863_p1)
}
  0x22   :  { %24 = dma.hbm_to_vmem [thread:$0]  %s1051_s0, 1024, %s955_s21, [#allocation3], %s919_s30, %s919_s30, %s920_s6  }
  0x23   :  { %s921_s18 = smov [#allocation7]   ;;  %s867_s23 = scalar_lea.hbm %s1054_s3, 1024 }
  0x24   :  { %s44_s19 = sshll.u32 %s921_s18, 4  ;;  %p868_p2 = scmp.ne.s32.totalorder %s1054_s3, %s867_s23  ;;  %s45_s19 = int_to_ptr.vmem [resolvable:$true] %s44_s19 }
  0x25   :  { %p871_p3 = scmp.lt.u32.totalorder %s867_s23, %s1054_s3 }
  0x27   :  { %p873_p4 = pnand %p871_p3, %p868_p2 }
  0x29   :  { %876 = shalt.err (!%p873_p4)
}
  0x2a   :  { %s877_s28 = scalar_lea.vmem %s45_s19, 1024  ;;  %p882_p6 = scmp.lt.s32.totalorder %s45_s19, %s45_s19 }
  0x2b   :  { %p878_p5 = scmp.ne.s32.totalorder %s45_s19, %s877_s28  ;;  %p883_p7 = scmp.lt.s32.totalorder %s877_s28, %s877_s28 }
  0x2d   :  { %p884_p8 = por %p883_p7, %p882_p6 }
  0x2f   :  { %p885_p9 = pnand %p884_p8, %p878_p5 }
  0x31   :  { %888 = shalt.err (!%p885_p9)
}
  0x32   :  { %50 = dma.hbm_to_vmem [thread:$0]  %s1054_s3, 1024, %s45_s19, [#allocation6], %s919_s30, %s919_s30, %s920_s6  }
  0x33   :  { %911 = dma.done.wait [#allocation3], 1024  }
  0x34   :  { %912 = vsyncadd [#allocation3], 4294966272 }
  0x35   :  { %913 = dma.done.wait [#allocation6], 2048  }
  0x36   :  { %914 = vsyncadd [#allocation6], 4294965248  ;;  %v767_v0 = vld [vmem:[#allocation5] sm:$0xff]   ;;  %v768_v1 = vld [vmem:[#allocation5 + $0x8] sm:$0xff]  }
  0x37   :  { %695 = vmatprep.subr.bf16.mxu0 %v767_v0  ;;  %v769_v2 = vld [vmem:[#allocation5 + $0x10] sm:$0xff]   ;;  %v770_v3 = vld [vmem:[#allocation5 + $0x18] sm:$0xff]   ;;  %v775_v4 = vld [vmem:[#allocation2] sm:$0xff]  }
  0x38   :  { %696 = vmatpush3.bf16.msra.mxu0 %v767_v0  ;;  %711 = vmatprep.mubr.bf16.mxu0 %v775_v4  ;;  %v771_v5 = vld [vmem:[#allocation5 + $0x20] sm:$0xff]   ;;  %v772_v6 = vld [vmem:[#allocation5 + $0x28] sm:$0xff]   ;;  %v773_v9 = vld [vmem:[#allocation5 + $0x30] sm:$0xff]  }
  0x39   :  { %697 = vmatprep.subr.bf16.mxu0 %v768_v1  ;;  %v783_v7 = vld [vmem:[#allocation7] sm:$0xff]   ;;  %v784_v8 = vld [vmem:[#allocation7 + $0x8] sm:$0xff]   ;;  %v774_v10 = vld [vmem:[#allocation5 + $0x38] sm:$0xff]  }
  0x3a   :  { %727 = vmatprep.subr.bf16.mxu1 %v783_v7  ;;  %v776_v11 = vld [vmem:[#allocation2 + $0x8] sm:$0xff]   ;;  %v777_v12 = vld [vmem:[#allocation2 + $0x10] sm:$0xff]   ;;  %v778_v13 = vld [vmem:[#allocation2 + $0x18] sm:$0xff]  }
  0x3b   :  { %728 = vmatpush3.bf16.msra.mxu1 %v783_v7  ;;  %v779_v14 = vld [vmem:[#allocation2 + $0x20] sm:$0xff]   ;;  %v780_v15 = vld [vmem:[#allocation2 + $0x28] sm:$0xff]   ;;  %v781_v16 = vld [vmem:[#allocation2 + $0x30] sm:$0xff]  }
  0x3c   :  { %698 = vmatpush3.bf16.msra.mxu0 %v768_v1  ;;  %729 = vmatprep.subr.bf16.mxu1 %v784_v8  ;;  %v782_v17 = vld [vmem:[#allocation2 + $0x38] sm:$0xff]   ;;  %v785_v18 = vld [vmem:[#allocation7 + $0x10] sm:$0xff]   ;;  %v787_v20 = vld [vmem:[#allocation7 + $0x20] sm:$0xff]  }
  0x3d   :  { %699 = vmatprep.subr.bf16.mxu0 %v769_v2  ;;  %v786_v19 = vld [vmem:[#allocation7 + $0x18] sm:$0xff]   ;;  %v788_v21 = vld [vmem:[#allocation7 + $0x28] sm:$0xff]   ;;  %v789_v22 = vld [vmem:[#allocation7 + $0x30] sm:$0xff]  }
  0x3e   :  { %v790_v23 = vld [vmem:[#allocation7 + $0x38] sm:$0xff]   ;;  %v1010_v24 = vld [vmem:[%s1053_s2] ss:$0 sm:$0xff] }
  0x3f   :  { %730 = vmatpush3.bf16.msra.mxu1 %v784_v8 }
  0x40   :  { %700 = vmatpush3.bf16.msra.mxu0 %v769_v2  ;;  %731 = vmatprep.subr.bf16.mxu1 %v785_v18 }
  0x41   :  { %701 = vmatprep.subr.bf16.mxu0 %v770_v3 }
  0x43   :  { %732 = vmatpush3.bf16.msra.mxu1 %v785_v18 }
  0x44   :  { %702 = vmatpush3.bf16.msra.mxu0 %v770_v3  ;;  %733 = vmatprep.subr.bf16.mxu1 %v786_v19 }
  0x45   :  { %703 = vmatprep.subr.bf16.mxu0 %v771_v5 }
  0x47   :  { %734 = vmatpush3.bf16.msra.mxu1 %v786_v19 }
  0x48   :  { %704 = vmatpush3.bf16.msra.mxu0 %v771_v5  ;;  %735 = vmatprep.subr.bf16.mxu1 %v787_v20 }
  0x49   :  { %705 = vmatprep.subr.bf16.mxu0 %v772_v6 }
  0x4b   :  { %736 = vmatpush3.bf16.msra.mxu1 %v787_v20 }
  0x4c   :  { %706 = vmatpush3.bf16.msra.mxu0 %v772_v6  ;;  %737 = vmatprep.subr.bf16.mxu1 %v788_v21 }
  0x4d   :  { %707 = vmatprep.subr.bf16.mxu0 %v773_v9 }
  0x4f   :  { %738 = vmatpush3.bf16.msra.mxu1 %v788_v21 }
  0x50   :  { %708 = vmatpush3.bf16.msra.mxu0 %v773_v9  ;;  %739 = vmatprep.subr.bf16.mxu1 %v789_v22 }
  0x51   :  { %709 = vmatprep.subr.bf16.mxu0 %v774_v10 }
  0x53   :  { %740 = vmatpush3.bf16.msra.mxu1 %v789_v22 }
  0x54   :  { %710 = vmatpush3.bf16.msra.mxu0 %v774_v10  ;;  %741 = vmatprep.subr.bf16.mxu1 %v790_v23 }
  0x57   :  { %712 = vmatmul.mubr.bf16.vlgmr.msra.gmra.mrb[0].mxu0 %v776_v11  ;;  %742 = vmatpush3.bf16.msra.mxu1 %v790_v23 }
  0x58   :  { %715 = vmatprep.mubr.bf16.mxu0 %v777_v12 }
  0x5f   :  { %716 = vmatmul.mubr.bf16.gmra.mrb[4].mxu0 %v778_v13 }
  0x60   :  { %719 = vmatprep.mubr.bf16.mxu0 %v779_v14 }
  0x67   :  { %720 = vmatmul.mubr.bf16.gmra.mrb[8].mxu0 %v780_v15 }
  0x68   :  { %723 = vmatprep.mubr.bf16.mxu0 %v781_v16 }
  0x6f   :  { %724 = vmatmul.mubr.bf16.gmra.mrb[12].mxu0 %v782_v17 }
 0x12a   :  { %v713_v25 = vpop.f32.mrb[0].mxu0 }
 0x12b   :  { %v268_v26 = vadd.f32 %v713_v25, %v1010_v24  ;;  %v259_v27 = vpop.f32.mrb[1].mxu0 }
 0x12c   :  { %v260_v28 = vadd.f32 %v1010_v24, %v259_v27  ;;  %v714_v29 = vpop.f32.mrb[2].mxu0 }
 0x12d   :  { %v340_v30 = vmul.f32 0.70710677, %v268_v26  ;;  %v271_v31 = vadd.f32 %v714_v29, %v1010_v24  ;;  %v262_v32 = vpop.f32.mrb[3].mxu0  ;;  %v324_v53 = vmul.f32 0.5, %v268_v26 }
 0x12e   :  { %v338_v33 = vmul.f32 0.70710677, %v260_v28  ;;  %v263_v34 = vadd.f32 %v1010_v24, %v262_v32  ;;  %v322_v63 = vmul.f32 0.5, %v260_v28 }
 0x12f   :  { %791 = verf.f32 %v340_v30  ;;  %v341_v35 = vmul.f32 0.70710677, %v271_v31  ;;  %v325_v58 = vmul.f32 0.5, %v271_v31 }
 0x130   :  { %793 = verf.f32 %v338_v33  ;;  %v339_v36 = vmul.f32 0.70710677, %v263_v34  ;;  %v323_v5 = vmul.f32 0.5, %v263_v34 }
 0x131   :  { %795 = verf.f32 %v341_v35 }
 0x132   :  { %797 = verf.f32 %v339_v36  ;;  %v717_v37 = vpop.f32.mrb[4].mxu0 }
 0x133   :  { %v284_v38 = vadd.f32 %v717_v37, %v1010_v24  ;;  %v275_v39 = vpop.f32.mrb[5].mxu0 }
 0x134   :  { %v276_v40 = vadd.f32 %v1010_v24, %v275_v39  ;;  %v718_v41 = vpop.f32.mrb[6].mxu0 }
 0x135   :  { %v344_v42 = vmul.f32 0.70710677, %v284_v38  ;;  %v287_v43 = vadd.f32 %v718_v41, %v1010_v24  ;;  %v278_v44 = vpop.f32.mrb[7].mxu0  ;;  %v328_v25 = vmul.f32 0.5, %v284_v38 }
 0x136   :  { %v342_v45 = vmul.f32 0.70710677, %v276_v40  ;;  %v279_v46 = vadd.f32 %v1010_v24, %v278_v44  ;;  %v326_v30 = vmul.f32 0.5, %v276_v40 }
 0x137   :  { %799 = verf.f32 %v344_v42  ;;  %v345_v47 = vmul.f32 0.70710677, %v287_v43  ;;  %v329_v26 = vmul.f32 0.5, %v287_v43 }
 0x138   :  { %801 = verf.f32 %v342_v45  ;;  %v343_v48 = vmul.f32 0.70710677, %v279_v46  ;;  %v327_v31 = vmul.f32 0.5, %v279_v46 }
 0x139   :  { %v792_v49 = vpop.eup %791  ;;  %803 = verf.f32 %v345_v47 }
 0x13a   :  { %v794_v50 = vpop.eup %793  ;;  %805 = verf.f32 %v343_v48  ;;  %v721_v51 = vpop.f32.mrb[8].mxu0  ;;  %v372_v54 = vadd.f32 1.0, %v792_v49 }
 0x13b   :  { %v796_v52 = vpop.eup %795  ;;  %v1021_v55 = vadd.f32 %v721_v51, %v1010_v24  ;;  %v291_v56 = vpop.f32.mrb[9].mxu0  ;;  %v370_v62 = vadd.f32 1.0, %v794_v50 }
 0x13c   :  { %v798_v57 = vpop.eup %797  ;;  %v373_v59 = vadd.f32 1.0, %v796_v52  ;;  %v1024_v60 = vadd.f32 %v1010_v24, %v291_v56  ;;  %v722_v61 = vpop.f32.mrb[10].mxu0  ;;  %v388_v8 = vmul.f32 %v372_v54, %v324_v53 }
 0x13d   :  { %v348_v0 = vmul.f32 0.70710677, %v1021_v55  ;;  %v303_v1 = vadd.f32 %v722_v61, %v1010_v24  ;;  %v294_v2 = vpop.f32.mrb[11].mxu0  ;;  %v371_v3 = vadd.f32 1.0, %v798_v57  ;;  %v386_v11 = vmul.f32 %v370_v62, %v322_v63 }
 0x13e   :  { %v389_v4 = vmul.f32 %v373_v59, %v325_v58  ;;  %v346_v6 = vmul.f32 0.70710677, %v1024_v60  ;;  %v295_v7 = vadd.f32 %v1010_v24, %v294_v2  ;;  %v332_v52 = vmul.f32 0.5, %v1021_v55 }
 0x13f   :  { %807 = verf.f32 %v348_v0  ;;  %v349_v9 = vmul.f32 0.70710677, %v303_v1  ;;  %v387_v12 = vmul.f32 %v371_v3, %v323_v5  ;;  %v333_v53 = vmul.f32 0.5, %v303_v1 }
 0x140   :  { %809 = verf.f32 %v346_v6  ;;  %v347_v10 = vmul.f32 0.70710677, %v295_v7  ;;  %v419_v14 = vpack.c.bf16 %v389_v4, %v388_v8  ;;  %v331_v56 = vmul.f32 0.5, %v295_v7 }
 0x141   :  { %v800_v13 = vpop.eup %799  ;;  %811 = verf.f32 %v349_v9  ;;  %v418_v18 = vpack.c.bf16 %v387_v12, %v386_v11 }
 0x142   :  { %v802_v15 = vpop.eup %801  ;;  %v376_v16 = vadd.f32 1.0, %v800_v13  ;;  %813 = verf.f32 %v347_v10  ;;  %v725_v17 = vpop.f32.mrb[12].mxu0 }
 0x143   :  { %v804_v19 = vpop.eup %803  ;;  %v374_v20 = vadd.f32 1.0, %v802_v15  ;;  %v316_v21 = vadd.f32 %v725_v17, %v1010_v24  ;;  %v307_v22 = vpop.f32.mrb[13].mxu0  ;;  %743 = vmatprep.mubr.bf16.mxu1 %v418_v18  ;;  %v637_v17 = vld [vmem:[%s1055_s4] ss:$0 sm:$0xff]  ;;  %s922_s4 = smov [#allocation8]  }
 0x144   :  { %v806_v23 = vpop.eup %805  ;;  %v377_v27 = vadd.f32 1.0, %v804_v19  ;;  %v308_v28 = vadd.f32 %v1010_v24, %v307_v22  ;;  %v726_v29 = vpop.f32.mrb[14].mxu0  ;;  %744 = vmatmul.mubr.bf16.vlgmr.msra.gmra.mrb[0].mxu1 %v419_v14  ;;  %v392_v35 = vmul.f32 %v376_v16, %v328_v25  ;;  %s624_s6 = sshll.u32 %s922_s4, 4  ;;  %s625_s6 = int_to_ptr.vmem [resolvable:$true] %s624_s6 }
 0x145   :  { %v375_v32 = vadd.f32 1.0, %v806_v23  ;;  %v352_v33 = vmul.f32 0.70710677, %v316_v21  ;;  %v310_v34 = vpop.f32.mrb[15].mxu0  ;;  %v319_v39 = vadd.f32 %v726_v29, %v1010_v24  ;;  %v390_v41 = vmul.f32 %v374_v20, %v326_v30  ;;  %s889_s7 = scalar_lea.vmem %s625_s6, 2048  ;;  %p894_p11 = scmp.lt.s32.totalorder %s625_s6, %s625_s6 }
 0x146   :  { %v393_v36 = vmul.f32 %v377_v27, %v329_v26  ;;  %v350_v37 = vmul.f32 0.70710677, %v308_v28  ;;  %v311_v38 = vadd.f32 %v1010_v24, %v310_v34  ;;  %v330_v24 = vmul.f32 0.5, %v1024_v60  ;;  %p890_p10 = scmp.ne.s32.totalorder %s625_s6, %s889_s7  ;;  %p895_p12 = scmp.lt.s32.totalorder %s889_s7, %s889_s7 }
 0x147   :  { %v391_v42 = vmul.f32 %v375_v32, %v327_v31  ;;  %815 = verf.f32 %v352_v33  ;;  %v353_v43 = vmul.f32 0.70710677, %v319_v39  ;;  %v336_v1 = vmul.f32 0.5, %v316_v21 }
 0x148   :  { %817 = verf.f32 %v350_v37  ;;  %v421_v44 = vpack.c.bf16 %v393_v36, %v392_v35  ;;  %v351_v40 = vmul.f32 0.70710677, %v311_v38  ;;  %v337_v8 = vmul.f32 0.5, %v319_v39  ;;  %p896_p13 = por %p895_p12, %p894_p11 }
 0x149   :  { %v808_v45 = vpop.eup %807  ;;  %v420_v46 = vpack.c.bf16 %v391_v42, %v390_v41  ;;  %819 = verf.f32 %v353_v43  ;;  %v334_v60 = vmul.f32 0.5, %v308_v28  ;;  %v335_v7 = vmul.f32 0.5, %v311_v38 }
 0x14a   :  { %v810_v47 = vpop.eup %809  ;;  %v380_v48 = vadd.f32 1.0, %v808_v45  ;;  %821 = verf.f32 %v351_v40  ;;  %p897_p0 = pnand %p896_p13, %p890_p10 }
 0x14b   :  { %v812_v49 = vpop.eup %811  ;;  %v378_v50 = vadd.f32 1.0, %v810_v47  ;;  %747 = vmatprep.mubr.bf16.mxu1 %v420_v46 }
 0x14c   :  { %v814_v51 = vpop.eup %813  ;;  %v381_v54 = vadd.f32 1.0, %v812_v49  ;;  %748 = vmatmul.mubr.bf16.gmra.mrb[4].mxu1 %v421_v44  ;;  %v396_v58 = vmul.f32 %v380_v48, %v332_v52 }
 0x14d   :  { %v379_v57 = vadd.f32 1.0, %v814_v51  ;;  %v394_v61 = vmul.f32 %v378_v50, %v330_v24 }
 0x14e   :  { %v397_v59 = vmul.f32 %v381_v54, %v333_v53 }
 0x14f   :  { %v395_v62 = vmul.f32 %v379_v57, %v331_v56 }
 0x150   :  { %v423_v63 = vpack.c.bf16 %v397_v59, %v396_v58 }
 0x151   :  { %v816_v0 = vpop.eup %815  ;;  %v422_v2 = vpack.c.bf16 %v395_v62, %v394_v61 }
 0x152   :  { %v818_v3 = vpop.eup %817  ;;  %v384_v4 = vadd.f32 1.0, %v816_v0 }
 0x153   :  { %751 = vmatprep.mubr.bf16.mxu1 %v422_v2  ;;  %v820_v5 = vpop.eup %819  ;;  %v382_v6 = vadd.f32 1.0, %v818_v3 }
 0x154   :  { %v822_v55 = vpop.eup %821  ;;  %v385_v9 = vadd.f32 1.0, %v820_v5  ;;  %752 = vmatmul.mubr.bf16.gmra.mrb[8].mxu1 %v423_v63  ;;  %v400_v11 = vmul.f32 %v384_v4, %v336_v1 }
 0x155   :  { %v383_v10 = vadd.f32 1.0, %v822_v55  ;;  %v398_v13 = vmul.f32 %v382_v6, %v334_v60 }
 0x156   :  { %v401_v12 = vmul.f32 %v385_v9, %v337_v8 }
 0x157   :  { %v399_v14 = vmul.f32 %v383_v10, %v335_v7 }
 0x158   :  { %v425_v15 = vpack.c.bf16 %v401_v12, %v400_v11 }
 0x159   :  { %v424_v16 = vpack.c.bf16 %v399_v14, %v398_v13 }
 0x15b   :  { %755 = vmatprep.mubr.bf16.mxu1 %v424_v16 }
 0x15c   :  { %756 = vmatmul.mubr.bf16.gmra.mrb[12].mxu1 %v425_v15 }
 0x217   :  { %v745_v18 = vpop.f32.mrb[0].mxu1 }
 0x218   :  { %v589_v19 = vadd.f32 %v745_v18, %v637_v17  ;;  %v524_v20 = vpop.f32.mrb[1].mxu1 }
 0x219   :  { %v587_v21 = vadd.f32 %v637_v17, %v524_v20  ;;  %v746_v22 = vpop.f32.mrb[2].mxu1 }
 0x21a   :  { %605 = vst [vmem:[#allocation8 + $0x10] sm:$0xff] %v589_v19  ;;  %v590_v23 = vadd.f32 %v746_v22, %v637_v17  ;;  %v527_v25 = vpop.f32.mrb[3].mxu1 }
 0x21b   :  { %603 = vst [vmem:[#allocation8] sm:$0xff] %v587_v21  ;;  %v588_v26 = vadd.f32 %v637_v17, %v527_v25 }
 0x21c   :  { %606 = vst [vmem:[#allocation8 + $0x18] sm:$0xff] %v590_v23 }
 0x21d   :  { %604 = vst [vmem:[#allocation8 + $0x8] sm:$0xff] %v588_v26 }
 0x21f   :  { %v749_v27 = vpop.f32.mrb[4].mxu1 }
 0x220   :  { %v593_v28 = vadd.f32 %v749_v27, %v637_v17  ;;  %v540_v29 = vpop.f32.mrb[5].mxu1 }
 0x221   :  { %v591_v30 = vadd.f32 %v637_v17, %v540_v29  ;;  %v750_v31 = vpop.f32.mrb[6].mxu1 }
 0x222   :  { %609 = vst [vmem:[#allocation8 + $0x30] sm:$0xff] %v593_v28  ;;  %v594_v32 = vadd.f32 %v750_v31, %v637_v17  ;;  %v543_v33 = vpop.f32.mrb[7].mxu1 }
 0x223   :  { %607 = vst [vmem:[#allocation8 + $0x20] sm:$0xff] %v591_v30  ;;  %v592_v34 = vadd.f32 %v637_v17, %v543_v33 }
 0x224   :  { %610 = vst [vmem:[#allocation8 + $0x38] sm:$0xff] %v594_v32 }
 0x225   :  { %608 = vst [vmem:[#allocation8 + $0x28] sm:$0xff] %v592_v34 }
 0x227   :  { %v753_v35 = vpop.f32.mrb[8].mxu1 }
 0x228   :  { %v597_v36 = vadd.f32 %v753_v35, %v637_v17  ;;  %v556_v37 = vpop.f32.mrb[9].mxu1 }
 0x229   :  { %v595_v39 = vadd.f32 %v637_v17, %v556_v37  ;;  %v754_v41 = vpop.f32.mrb[10].mxu1 }
 0x22a   :  { %613 = vst [vmem:[#allocation8 + $0x50] sm:$0xff] %v597_v36  ;;  %v598_v42 = vadd.f32 %v754_v41, %v637_v17  ;;  %v559_v38 = vpop.f32.mrb[11].mxu1 }
 0x22b   :  { %611 = vst [vmem:[#allocation8 + $0x40] sm:$0xff] %v595_v39  ;;  %v596_v43 = vadd.f32 %v637_v17, %v559_v38 }
 0x22c   :  { %614 = vst [vmem:[#allocation8 + $0x58] sm:$0xff] %v598_v42 }
 0x22d   :  { %612 = vst [vmem:[#allocation8 + $0x48] sm:$0xff] %v596_v43 }
 0x22f   :  { %v757_v44 = vpop.f32.mrb[12].mxu1 }
 0x230   :  { %v601_v45 = vadd.f32 %v757_v44, %v637_v17  ;;  %v572_v40 = vpop.f32.mrb[13].mxu1 }
 0x231   :  { %v599_v46 = vadd.f32 %v637_v17, %v572_v40  ;;  %v758_v47 = vpop.f32.mrb[14].mxu1 }
 0x232   :  { %617 = vst [vmem:[#allocation8 + $0x70] sm:$0xff] %v601_v45  ;;  %v602_v48 = vadd.f32 %v758_v47, %v637_v17  ;;  %v575_v49 = vpop.f32.mrb[15].mxu1 }
 0x233   :  { %615 = vst [vmem:[#allocation8 + $0x60] sm:$0xff] %v599_v46  ;;  %v600_v50 = vadd.f32 %v637_v17, %v575_v49 }
 0x234   :  { %618 = vst [vmem:[#allocation8 + $0x78] sm:$0xff] %v602_v48 }
 0x235   :  { %616 = vst [vmem:[#allocation8 + $0x68] sm:$0xff] %v600_v50 }
 0x236   :  { %900 = shalt.err (!%p897_p0)
}
 0x237   :  { %s901_s10 = scalar_lea.hbm %s1056_s5, 2048 }
 0x238   :  { %p902_p1 = scmp.ne.s32.totalorder %s1056_s5, %s901_s10  ;;  %p905_p2 = scmp.lt.u32.totalorder %s901_s10, %s1056_s5 }
 0x23a   :  { %p907_p3 = pnand %p905_p2, %p902_p1 }
 0x23c   :  { %910 = shalt.err (!%p907_p3)
}
 0x23d   :  { %s923_s15 = smov 128   ;;  %s924_s16 = smov 8  }
 0x23e   :  { %630 = dma.vmem_to_hbm [thread:$0]  %s625_s6, 2048, %s1056_s5, [#allocation4], %s923_s15, %s923_s15, %s924_s16  }
 0x23f   :  { %915 = dma.done.wait [#allocation4], 2048  }
 0x240   :  { %916 = vsyncadd [#allocation4], 4294965248 }
 0x241   :  { %634 = vsyncpa [#allocation3], 1 }
 0x242   :  { %635 = vsyncpa [#allocation6], 1 }
 0x243   :  { %636 = vsyncpa [#allocation4], 1 }

</bundles_post_ra>
